<compile_context>
chip_gen: v7x
topology: tpu7x:2x2x1
jax: 0.10.0
libtpu: 0.0.40
codegen_flags: <defaults>
</compile_context>

<pallas_src>
import functools
import math

import jax
import jax.numpy as jnp
from jax.experimental import pallas as pl


# ---------------------------------------------------------------------------
# Fused Pallas kernel: whole SingleRNBlock forward, full batch, VMEM-resident
# ---------------------------------------------------------------------------
def _single_rn_block_kernel(x_ref, w1y_ref, w1x_ref, b1_ref, w2_ref, b2_ref,
                            wf1_ref, bf1_ref, wf2_ref, bf2_ref, out_ref, *, B, N):
    D = x_ref.shape[-1]
    xf = x_ref[...].reshape(B * N, D)                     # flatten batch: (B*N, D)

    # Relation-net Linear #1, decomposed across the pair concat:
    #   Linear1(pairs)[b,i,j] = X[b,j] @ W1y + X[b,i] @ W1x + b1
    a = jnp.dot(xf, w1y_ref[...], preferred_element_type=jnp.float32)                # j-term (B*N, H)
    c = jnp.dot(xf, w1x_ref[...], preferred_element_type=jnp.float32) + b1_ref[...]  # i-term + bias

    # Pairwise ReLU + sum-pool over j, per batch element (B is tiny → static unroll,
    # rank-3 broadcast-add + sublane-axis reduction; no pair tensor ever hits HBM).
    s_parts = []
    for b in range(B):
        ab = a[b * N:(b + 1) * N]                         # (N, H), indexed by j
        cb = c[b * N:(b + 1) * N]                         # (N, H), indexed by i
        h = jnp.maximum(cb[:, None, :] + ab[None, :, :], 0.0)   # (N_i, N_j, H)
        s_parts.append(jnp.sum(h, axis=1))                # sum over j -> (N_i, H)
    s = jnp.concatenate(s_parts, axis=0)                  # (B*N, H)

    # Relation-net Linear #2; its bias is summed over the M = N pooled pairs.
    rn = jnp.dot(s, w2_ref[...], preferred_element_type=jnp.float32) + N * b2_ref[...]
    z = xf + rn                                           # residual 1
    # TODO(synk): nn.Dropout(0.1) is treated as eval-mode identity (no stochastic mask).

    # fc MLP + residual 2.
    hf = jnp.maximum(
        jnp.dot(z, wf1_ref[...], preferred_element_type=jnp.float32) + bf1_ref[...], 0.0)
    z = z + jnp.dot(hf, wf2_ref[...], preferred_element_type=jnp.float32) + bf2_ref[...]

    out_ref[...] = z.reshape(B, N, D)


@jax.jit
def single_rn_block_pallas(x, params):
    B, N, D = x.shape
    w1 = params['w1']                                     # (2D, H)
    w1y, w1x = w1[:D], w1[D:]                             # Y-half / X-half of Linear #1
    args = (x, w1y, w1x, params['b1'], params['w2'], params['b2'],
            params['wf1'], params['bf1'], params['wf2'], params['bf2'])
    # No grid, no explicit BlockSpecs: single kernel invocation, every operand is
    # passed as a full array resident in VMEM (total footprint ~ tens of KiB).
    return pl.pallas_call(
        functools.partial(_single_rn_block_kernel, B=B, N=N),
        out_shape=jax.ShapeDtypeStruct((B, N, D), jnp.float32),
    )(*args)


# ---------------------------------------------------------------------------
# Pure-JAX reference (mirrors the PyTorch forward literally, for correctness)
# ---------------------------------------------------------------------------
def single_rn_block_ref(x, params):
    B, N, D = x.shape
    y_exp = jnp.broadcast_to(x[:, None, :, :], (B, N, N, D))   # indexed by j
    x_exp = jnp.broadcast_to(x[:, :, None, :], (B, N, N, D))   # indexed by i
    pairs = jnp.concatenate([y_exp, x_exp], axis=-1)            # (B, N, N, 2D)
    h = jnp.maximum(pairs @ params['w1'] + params['b1'], 0.0)
    zp = h @ params['w2'] + params['b2']                        # (B, N, N, D)
    rn = jnp.sum(zp, axis=2)                                    # pool='sum' over j
    z = x + rn
    hf = jnp.maximum(z @ params['wf1'] + params['bf1'], 0.0)
    return z + hf @ params['wf2'] + params['bf2']


# ---------------------------------------------------------------------------
# Deterministic parameter init (synthetic; torch.nn.Linear-style uniform)
# ---------------------------------------------------------------------------
def _init_linear(key, din, dout):
    kw, kb = jax.random.split(key)
    bound = 1.0 / math.sqrt(din)
    w = jax.random.uniform(kw, (din, dout), jnp.float32, -bound, bound)
    b = jax.random.uniform(kb, (1, dout), jnp.float32, -bound, bound)
    return w, b


def init_single_rn_block(key, latent_size, hidden_size):
    ks = jax.random.split(key, 4)
    p = {}
    p['w1'], p['b1'] = _init_linear(ks[0], 2 * latent_size, hidden_size)   # rn.net Linear 1
    p['w2'], p['b2'] = _init_linear(ks[1], hidden_size, latent_size)       # rn.net Linear 2
    p['wf1'], p['bf1'] = _init_linear(ks[2], latent_size, hidden_size)     # fc Linear 1
    p['wf2'], p['bf2'] = _init_linear(ks[3], hidden_size, latent_size)     # fc Linear 2
    return p


# ---------------------------------------------------------------------------
if __name__ == "__main__":
    B, N = 2, 8
    latent_size, hidden_size = 32, 64

    key = jax.random.PRNGKey(0)
    kx, kp = jax.random.split(key)
    x = jax.random.normal(kx, (B, N, latent_size), jnp.float32)
    params = init_single_rn_block(kp, latent_size, hidden_size)

    out = jax.block_until_ready(single_rn_block_pallas(x, params))
    ref = jax.block_until_ready(single_rn_block_ref(x, params))

    assert out.shape == (B, N, latent_size), out.shape
    assert jnp.allclose(out, ref, rtol=1e-4, atol=1e-4), \
        float(jnp.max(jnp.abs(out - ref)))

    print("KERNEL_OK")
</pallas_src>

<mosaic_0001>
module attributes {stable_mosaic.version = 11 : i64} {
  func.func @_single_rn_block_kernel(%arg0: memref<2x8x32xf32, #tpu.memory_space<vmem>>, %arg1: memref<32x64xf32, #tpu.memory_space<vmem>>, %arg2: memref<32x64xf32, #tpu.memory_space<vmem>>, %arg3: memref<1x64xf32, #tpu.memory_space<vmem>>, %arg4: memref<64x32xf32, #tpu.memory_space<vmem>>, %arg5: memref<1x32xf32, #tpu.memory_space<vmem>>, %arg6: memref<32x64xf32, #tpu.memory_space<vmem>>, %arg7: memref<1x64xf32, #tpu.memory_space<vmem>>, %arg8: memref<64x32xf32, #tpu.memory_space<vmem>>, %arg9: memref<1x32xf32, #tpu.memory_space<vmem>>, %arg10: memref<2x8x32xf32, #tpu.memory_space<vmem>>) attributes {dimension_semantics = [], scalar_prefetch = 0 : i64, scratch_operands = 0 : i64, tpu.core_type = #tpu.core_type<tc>} {
    %c0 = arith.constant 0 : index
    %c0_0 = arith.constant 0 : index
    %c0_1 = arith.constant 0 : index
    %0 = vector.load %arg0[%c0, %c0_0, %c0_1] : memref<2x8x32xf32, #tpu.memory_space<vmem>>, vector<2x8x32xf32>
    %1 = vector.shape_cast %0 : vector<2x8x32xf32> to vector<16x32xf32>
    %c0_2 = arith.constant 0 : index
    %c0_3 = arith.constant 0 : index
    %2 = vector.load %arg1[%c0_2, %c0_3] : memref<32x64xf32, #tpu.memory_space<vmem>>, vector<32x64xf32>
    %cst = arith.constant dense<0.000000e+00> : vector<16x64xf32>
    %3 = tpu.matmul %1, %2, %cst {dimension_numbers = #tpu.dot_dimension_numbers<[1], [0], [0], [1], [0, 0, 1, 1], [], []>} : vector<16x32xf32>, vector<32x64xf32>, vector<16x64xf32> -> vector<16x64xf32>
    %c0_4 = arith.constant 0 : index
    %c0_5 = arith.constant 0 : index
    %4 = vector.load %arg2[%c0_4, %c0_5] : memref<32x64xf32, #tpu.memory_space<vmem>>, vector<32x64xf32>
    %cst_6 = arith.constant dense<0.000000e+00> : vector<16x64xf32>
    %5 = tpu.matmul %1, %4, %cst_6 {dimension_numbers = #tpu.dot_dimension_numbers<[1], [0], [0], [1], [0, 0, 1, 1], [], []>} : vector<16x32xf32>, vector<32x64xf32>, vector<16x64xf32> -> vector<16x64xf32>
    %c0_7 = arith.constant 0 : index
    %c0_8 = arith.constant 0 : index
    %6 = vector.load %arg3[%c0_7, %c0_8] : memref<1x64xf32, #tpu.memory_space<vmem>>, vector<1x64xf32>
    %7 = vector.broadcast %6 : vector<1x64xf32> to vector<16x64xf32>
    %8 = arith.addf %5, %7 : vector<16x64xf32>
    %9 = vector.extract_strided_slice %3 {offsets = [0, 0], sizes = [8, 64], strides = [1, 1]} : vector<16x64xf32> to vector<8x64xf32>
    %10 = vector.extract_strided_slice %8 {offsets = [0, 0], sizes = [8, 64], strides = [1, 1]} : vector<16x64xf32> to vector<8x64xf32>
    %11 = vector.shape_cast %10 : vector<8x64xf32> to vector<8x1x64xf32>
    %12 = vector.shape_cast %9 : vector<8x64xf32> to vector<1x8x64xf32>
    %13 = vector.broadcast %11 : vector<8x1x64xf32> to vector<8x8x64xf32>
    %14 = vector.broadcast %12 : vector<1x8x64xf32> to vector<8x8x64xf32>
    %15 = arith.addf %13, %14 : vector<8x8x64xf32>
    %cst_9 = arith.constant 0.000000e+00 : f32
    %16 = vector.broadcast %cst_9 : f32 to vector<8x8x64xf32>
    %17 = arith.maximumf %15, %16 : vector<8x8x64xf32>
    %cst_10 = arith.constant dense<0.000000e+00> : vector<8x64xf32>
    %18 = vector.multi_reduction <add>, %17, %cst_10 [1] : vector<8x8x64xf32> to vector<8x64xf32>
    %19 = vector.extract_strided_slice %3 {offsets = [8, 0], sizes = [8, 64], strides = [1, 1]} : vector<16x64xf32> to vector<8x64xf32>
    %20 = vector.extract_strided_slice %8 {offsets = [8, 0], sizes = [8, 64], strides = [1, 1]} : vector<16x64xf32> to vector<8x64xf32>
    %21 = vector.shape_cast %20 : vector<8x64xf32> to vector<8x1x64xf32>
    %22 = vector.shape_cast %19 : vector<8x64xf32> to vector<1x8x64xf32>
    %23 = vector.broadcast %21 : vector<8x1x64xf32> to vector<8x8x64xf32>
    %24 = vector.broadcast %22 : vector<1x8x64xf32> to vector<8x8x64xf32>
    %25 = arith.addf %23, %24 : vector<8x8x64xf32>
    %cst_11 = arith.constant 0.000000e+00 : f32
    %26 = vector.broadcast %cst_11 : f32 to vector<8x8x64xf32>
    %27 = arith.maximumf %25, %26 : vector<8x8x64xf32>
    %cst_12 = arith.constant dense<0.000000e+00> : vector<8x64xf32>
    %28 = vector.multi_reduction <add>, %27, %cst_12 [1] : vector<8x8x64xf32> to vector<8x64xf32>
    %29 = tpu.concatenate %18, %28 in 0 : vector<8x64xf32>, vector<8x64xf32> -> vector<16x64xf32>
    %c0_13 = arith.constant 0 : index
    %c0_14 = arith.constant 0 : index
    %30 = vector.load %arg4[%c0_13, %c0_14] : memref<64x32xf32, #tpu.memory_space<vmem>>, vector<64x32xf32>
    %cst_15 = arith.constant dense<0.000000e+00> : vector<16x32xf32>
    %31 = tpu.matmul %29, %30, %cst_15 {dimension_numbers = #tpu.dot_dimension_numbers<[1], [0], [0], [1], [0, 0, 1, 1], [], []>} : vector<16x64xf32>, vector<64x32xf32>, vector<16x32xf32> -> vector<16x32xf32>
    %c0_16 = arith.constant 0 : index
    %c0_17 = arith.constant 0 : index
    %32 = vector.load %arg5[%c0_16, %c0_17] : memref<1x32xf32, #tpu.memory_space<vmem>>, vector<1x32xf32>
    %cst_18 = arith.constant 8.000000e+00 : f32
    %33 = vector.broadcast %cst_18 : f32 to vector<1x32xf32>
    %34 = arith.mulf %33, %32 : vector<1x32xf32>
    %35 = vector.broadcast %34 : vector<1x32xf32> to vector<16x32xf32>
    %36 = arith.addf %31, %35 : vector<16x32xf32>
    %37 = arith.addf %1, %36 : vector<16x32xf32>
    %c0_19 = arith.constant 0 : index
    %c0_20 = arith.constant 0 : index
    %38 = vector.load %arg6[%c0_19, %c0_20] : memref<32x64xf32, #tpu.memory_space<vmem>>, vector<32x64xf32>
    %cst_21 = arith.constant dense<0.000000e+00> : vector<16x64xf32>
    %39 = tpu.matmul %37, %38, %cst_21 {dimension_numbers = #tpu.dot_dimension_numbers<[1], [0], [0], [1], [0, 0, 1, 1], [], []>} : vector<16x32xf32>, vector<32x64xf32>, vector<16x64xf32> -> vector<16x64xf32>
    %c0_22 = arith.constant 0 : index
    %c0_23 = arith.constant 0 : index
    %40 = vector.load %arg7[%c0_22, %c0_23] : memref<1x64xf32, #tpu.memory_space<vmem>>, vector<1x64xf32>
    %41 = vector.broadcast %40 : vector<1x64xf32> to vector<16x64xf32>
    %42 = arith.addf %39, %41 : vector<16x64xf32>
    %cst_24 = arith.constant 0.000000e+00 : f32
    %43 = vector.broadcast %cst_24 : f32 to vector<16x64xf32>
    %44 = arith.maximumf %42, %43 : vector<16x64xf32>
    %c0_25 = arith.constant 0 : index
    %c0_26 = arith.constant 0 : index
    %45 = vector.load %arg8[%c0_25, %c0_26] : memref<64x32xf32, #tpu.memory_space<vmem>>, vector<64x32xf32>
    %cst_27 = arith.constant dense<0.000000e+00> : vector<16x32xf32>
    %46 = tpu.matmul %44, %45, %cst_27 {dimension_numbers = #tpu.dot_dimension_numbers<[1], [0], [0], [1], [0, 0, 1, 1], [], []>} : vector<16x64xf32>, vector<64x32xf32>, vector<16x32xf32> -> vector<16x32xf32>
    %47 = arith.addf %37, %46 : vector<16x32xf32>
    %c0_28 = arith.constant 0 : index
    %c0_29 = arith.constant 0 : index
    %48 = vector.load %arg9[%c0_28, %c0_29] : memref<1x32xf32, #tpu.memory_space<vmem>>, vector<1x32xf32>
    %49 = vector.broadcast %48 : vector<1x32xf32> to vector<16x32xf32>
    %50 = arith.addf %47, %49 : vector<16x32xf32>
    %51 = vector.shape_cast %50 : vector<16x32xf32> to vector<2x8x32xf32>
    %c0_30 = arith.constant 0 : index
    %c0_31 = arith.constant 0 : index
    %c0_32 = arith.constant 0 : index
    %52 = vector.load %arg10[%c0_30, %c0_31, %c0_32] : memref<2x8x32xf32, #tpu.memory_space<vmem>>, vector<2x8x32xf32>
    tpu.vector_store %arg10[%c0_30, %c0_31, %c0_32], %51 {strides = array<i32>} : memref<2x8x32xf32, #tpu.memory_space<vmem>>, vector<2x8x32xf32>,
    return
  }
}

</mosaic_0001>

<bundles_post_ra>
// kernel: single_rn_block_pallas.1
= control target key start
LH: loop header
LB: loop body
LE: loop exit
PB: predicated region body
PF: predicated region fallthrough
CT: control target
= control target key end

     0   :  { %vm42_vm0 = vcmask 261120   ;;  %s1387_s0 = inlined_call_operand.vmem [shape: f32[2,8,32], index: 0, kind: input, shape index: {}]   ;;  %s1388_s1 = inlined_call_operand.vmem [shape: f32[32,64], index: 1, kind: input, shape index: {}]   ;;  %s1389_s2 = inlined_call_operand.vmem [shape: f32[32,64], index: 2, kind: input, shape index: {}]   ;;  %s1390_s3 = inlined_call_operand.vmem [shape: f32[1,64], index: 3, kind: input, shape index: {}]   ;;  %s1391_s4 = inlined_call_operand.vmem [shape: f32[64,32], index: 4, kind: input, shape index: {}]   ;;  %s1392_s5 = inlined_call_operand.vmem [shape: f32[1,32], index: 5, kind: input, shape index: {}]   ;;  %s1393_s6 = inlined_call_operand.vmem [shape: f32[32,64], index: 6, kind: input, shape index: {}]   ;;  %s1394_s7 = inlined_call_operand.vmem [shape: f32[1,64], index: 7, kind: input, shape index: {}]   ;;  %s1395_s8 = inlined_call_operand.vmem [shape: f32[64,32], index: 8, kind: input, shape index: {}]   ;;  %s1396_s9 = inlined_call_operand.vmem [shape: f32[1,32], index: 9, kind: input, shape index: {}]   ;;  %s1397_s10 = inlined_call_operand.hbm [shape: f32[2,8,32], index: 10, kind: output, shape index: {}]  }
   0x1   :  { %v124_v0 = vld [vmem:[%s1389_s2] sm:$0xff]  ;;  %v125_v1 = vld [vmem:[%s1389_s2 + $0x8] sm:$0xff]  ;;  %v126_v2 = vld [vmem:[%s1389_s2 + $0x10] sm:$0xff] }
   0x2   :  { %v1011_v3 = vpack.c.bf16 %v125_v1, %v124_v0  ;;  %v127_v4 = vld [vmem:[%s1389_s2 + $0x18] sm:$0xff]  ;;  %v1161_v5 = vld [vmem:[%s1387_s0] sm:$0xff]  ;;  %v39_v8 = vld [vmem:[%s1388_s1 + $0x8] sm:$0xff] }
   0x3   :  { %v38_v6 = vld [vmem:[%s1388_s1] sm:$0xff]  ;;  %v1015_v7 = vpack.c.bf16 %v127_v4, %v126_v2  ;;  %951 = vmatprep.mubr.msk.f32.mxu1 %vm42_vm0, %v1161_v5  ;;  %v40_v9 = vld [vmem:[%s1388_s1 + $0x10] sm:$0xff]  ;;  %940 = vmatprep.mubr.msk.f32.mxu0 %vm42_vm0, %v1161_v5  ;;  %v41_v11 = vld [vmem:[%s1388_s1 + $0x18] sm:$0xff] }
   0x4   :  { %1012 = vmatprep.subr.bf16.mxu1 %v1011_v3  ;;  %v1003_v10 = vpack.c.bf16 %v39_v8, %v38_v6 }
   0x5   :  { %15 = vsyncpa [#allocation3], 0  ;;  %1014 = vmatpush3.bf16.msra.mxu1 %v1011_v3  ;;  %v1007_v12 = vpack.c.bf16 %v41_v11, %v40_v9  ;;  %v1182_v13 = vld [vmem:[%s1387_s0 + $0x8] sm:$0xff]  ;;  %v572_v14 = vld [vmem:[%s1391_s4] sm:$0xff]  ;;  %v1087_v29 = vmov 1966171168   ;;  %v215_v31 = vlaneseq }
   0x6   :  { %1016 = vmatprep.subr.bf16.mxu1 %v1015_v7  ;;  %1004 = vmatprep.subr.bf16.mxu0 %v1003_v10  ;;  %v573_v15 = vld [vmem:[%s1391_s4 + $0x8] sm:$0xff]  ;;  %v574_v17 = vld [vmem:[%s1391_s4 + $0x10] sm:$0xff]  ;;  %v575_v18 = vld [vmem:[%s1391_s4 + $0x18] sm:$0xff]  ;;  %v213_v30 = vunpack.c.l.s4 %v1087_v29  ;;  %vm316_vm1 = vcmask 523264   ;;  %vm543_vm2 = vcmask 1041409   ;;  %vm545_vm3 = vcmask 1042434  }
   0x7   :  { %1006 = vmatpush3.bf16.msra.mxu0 %v1003_v10  ;;  %v1019_v16 = vpack.c.bf16 %v573_v15, %v572_v14  ;;  %v576_v19 = vld [vmem:[%s1391_s4 + $0x20] sm:$0xff]  ;;  %v1023_v20 = vpack.c.bf16 %v575_v18, %v574_v17  ;;  %v577_v21 = vld [vmem:[%s1391_s4 + $0x28] sm:$0xff]  ;;  %v578_v23 = vld [vmem:[%s1391_s4 + $0x30] sm:$0xff]  ;;  %v216_v33 = vshrl.u32 %v215_v31, 7  ;;  %vm547_vm4 = vcmask 1043459  }
   0x8   :  { %1008 = vmatprep.subr.bf16.mxu0 %v1007_v12  ;;  %v1027_v22 = vpack.c.bf16 %v577_v21, %v576_v19  ;;  %v579_v24 = vld [vmem:[%s1391_s4 + $0x38] sm:$0xff]  ;;  %v669_v26 = vld [vmem:[%s1393_s6] sm:$0xff]  ;;  %v670_v27 = vld [vmem:[%s1393_s6 + $0x8] sm:$0xff]  ;;  %v214_v32 = vunpack.c.0.s8 %v213_v30  ;;  %vm549_vm5 = vcmask 1044484   ;;  %vm551_vm6 = vcmask 1045509   ;;  %s1088_s4 = smov [#allocation2]  }
   0x9   :  { %1018 = vmatpush3.bf16.msra.mxu1 %v1015_v7  ;;  %v1031_v25 = vpack.c.bf16 %v579_v24, %v578_v23  ;;  %v1035_v28 = vpack.c.bf16 %v670_v27, %v669_v26  ;;  %v883_v34 = vld [vmem:[%s1390_s3] ss:$0 sm:$0xff]  ;;  %v1225_v44 = vsub.s32 0, %v216_v33  ;;  %vm553_vm7 = vcmask 1046534   ;;  %s870_s29 = sshll.u32 %s1088_s4, 4  ;;  %s871_s29 = int_to_ptr.vmem [resolvable:$true] %s870_s29 }
   0xa   :  { %v217_v35 = vsub.s32 %v214_v32, %v216_v33  ;;  %vm555_vm8 = vcmask 1047559   ;;  %p1068_p1 = scmp.lt.s32.totalorder %s871_s29, %s871_s29 }
   0xb   :  { %1010 = vmatpush3.bf16.msra.mxu0 %v1007_v12  ;;  %1036 = vmatprep.subr.bf16.mxu1 %v1035_v28 }
   0xc   :  { %952 = vmatmul.mubr.msk.f32.vlgmr.msra.gmra.mrb[0].mxu1 %vm42_vm0, %v1182_v13  ;;  %1020 = vmatprep.subr.bf16.mxu0 %v1019_v16 }
   0xd   :  { %1038 = vmatpush3.bf16.msra.mxu1 %v1035_v28 }
   0xe   :  { %941 = vmatmul.mubr.msk.f32.vlgmr.msra.gmra.mrb[0].mxu0 %vm42_vm0, %v1182_v13 }
   0xf   :  { %1022 = vmatpush3.bf16.msra.mxu0 %v1019_v16 }
  0x10   :  { %1024 = vmatprep.subr.bf16.mxu0 %v1023_v20 }
  0x13   :  { %1026 = vmatpush3.bf16.msra.mxu0 %v1023_v20 }
  0x14   :  { %1028 = vmatprep.subr.bf16.mxu0 %v1027_v22 }
  0x17   :  { %1030 = vmatpush3.bf16.msra.mxu0 %v1027_v22 }
  0x18   :  { %1032 = vmatprep.subr.bf16.mxu0 %v1031_v25 }
  0x1b   :  { %1034 = vmatpush3.bf16.msra.mxu0 %v1031_v25 }
  0xdf   :  { %v953_v36 = vpop.f32.mrb[0].mxu1 }
  0xe0   :  { %v207_v37 = vadd.f32 %v953_v36, %v883_v34  ;;  %v201_v38 = vpop.f32.mrb[1].mxu1 }
  0xe1   :  { %v202_v39 = vadd.f32 %v883_v34, %v201_v38  ;;  %v1221_v40 = vpop.f32.mrb[0].mxu0 }
  0xe2   :  { %v374_v41 = vcombine.high %v207_v37, %v207_v37  ;;  %v381_v42 = vrot.slane %v207_v37, %v217_v35  ;;  %v1223_v43 = vpop.f32.mrb[1].mxu0 }
  0xe3   :  { %v211_v45 = vcombine.high %v202_v39, %v202_v39  ;;  %v218_v46 = vrot.slane %v202_v39, %v217_v35 }
  0xe4   :  { %v388_v47 = vrot.slane %v374_v41, %v217_v35  ;;  %v389_v48 = vcombine.high %v381_v42, %v381_v42  ;;  %v397_v49 = vrot.slane %v381_v42, %v217_v35 }
  0xe5   :  { %v225_v50 = vrot.slane %v211_v45, %v217_v35  ;;  %v226_v51 = vcombine.high %v218_v46, %v218_v46  ;;  %v234_v52 = vrot.slane %v218_v46, %v217_v35 }
  0xe6   :  { %v390_v53 = vcombine.high %v388_v47, %v388_v47  ;;  %v404_v54 = vrot.slane %v388_v47, %v217_v35  ;;  %v411_v55 = vrot.slane %v389_v48, %v217_v35  ;;  %v419_v56 = vcombine.high %v397_v49, %v397_v49 }
  0xe7   :  { %v426_v57 = vrot.slane %v397_v49, %v1225_v44  ;;  %v227_v58 = vcombine.high %v225_v50, %v225_v50  ;;  %v241_v59 = vrot.slane %v225_v50, %v217_v35  ;;  %v248_v60 = vrot.slane %v226_v51, %v217_v35 }
  0xe8   :  { %v418_v61 = vrot.slane %v390_v53, %v217_v35  ;;  %v420_v62 = vcombine.high %v404_v54, %v404_v54  ;;  %v421_v63 = vcombine.high %v411_v55, %v411_v55  ;;  %v430_v0 = vrot.slane %v411_v55, %v1225_v44 }
  0xe9   :  { %v434_v1 = vrot.slane %v419_v56, %v1225_v44  ;;  %v442_v2 = vrot.slane %v404_v54, %v1225_v44  ;;  %v255_v3 = vrot.slane %v227_v58, %v217_v35  ;;  %v256_v4 = vcombine.high %v234_v52, %v234_v52 }
  0xea   :  { %v422_v6 = vcombine.high %v418_v61, %v418_v61  ;;  %v438_v7 = vrot.slane %v421_v63, %v1225_v44  ;;  %v446_v8 = vrot.slane %v418_v61, %v1225_v44  ;;  %v450_v9 = vrot.slane %v420_v62, %v1225_v44 }
  0xeb   :  { %v257_v10 = vcombine.high %v241_v59, %v241_v59  ;;  %v258_v11 = vcombine.high %v248_v60, %v248_v60  ;;  %v259_v12 = vcombine.high %v255_v3, %v255_v3  ;;  %v263_v14 = vrot.slane %v234_v52, %v1225_v44 }
  0xec   :  { %v1236_v15 = vrot.slane %v422_v6, %v1225_v44  ;;  %v267_v16 = vrot.slane %v248_v60, %v1225_v44  ;;  %v271_v17 = vrot.slane %v256_v4, %v1225_v44  ;;  %v279_v18 = vrot.slane %v241_v59, %v1225_v44 }
  0xed   :  { %v275_v19 = vrot.slane %v258_v11, %v1225_v44  ;;  %v283_v20 = vrot.slane %v255_v3, %v1225_v44  ;;  %v287_v21 = vrot.slane %v257_v10, %v1225_v44  ;;  %v291_v22 = vrot.slane %v259_v12, %v1225_v44 }
  0xee   :  { %v463_v23 = vadd.f32 %v1221_v40, %v426_v57  ;;  %v464_v24 = vadd.f32 %v1221_v40, %v430_v0  ;;  %v465_v25 = vadd.f32 %v1221_v40, %v434_v1  ;;  %v466_v26 = vadd.f32 %v1221_v40, %v438_v7 }
  0xef   :  { %v1250_v27 = vadd.f32 %v1221_v40, %v442_v2  ;;  %v1253_v28 = vadd.f32 %v1221_v40, %v446_v8  ;;  %v1256_v29 = vadd.f32 %v1221_v40, %v450_v9  ;;  %v300_v30 = vadd.f32 %v263_v14, %v1223_v43 }
  0xf0   :  { %v471_v31 = vmax.f32 %v463_v23, 0.0  ;;  %v472_v32 = vmax.f32 %v464_v24, 0.0  ;;  %v473_v33 = vmax.f32 %v465_v25, 0.0  ;;  %v474_v34 = vmax.f32 %v466_v26, 0.0 }
  0xf1   :  { %v475_v35 = vmax.f32 %v1250_v27, 0.0  ;;  %v476_v36 = vmax.f32 %v1253_v28, 0.0  ;;  %v301_v37 = vadd.f32 %v267_v16, %v1223_v43  ;;  %v302_v38 = vadd.f32 %v271_v17, %v1223_v43 }
  0xf2   :  { %v479_v39 = vsel %vm316_vm1, %v471_v31, 0.0  ;;  %v486_v41 = vsel %vm316_vm1, %v472_v32, 0.0  ;;  %v493_v42 = vsel %vm316_vm1, %v473_v33, 0.0  ;;  %v1267_v45 = vsel %vm316_vm1, %v474_v34, 0.0 }
  0xf3   :  { %v480_v46 = vrot.slane %v479_v39, 4  ;;  %v487_v47 = vrot.slane %v486_v41, 4  ;;  %v494_v48 = vrot.slane %v493_v42, 4  ;;  %v501_v49 = vrot.slane %v1267_v45, 4 }
  0xf4   :  { %v303_v50 = vadd.f32 %v275_v19, %v1223_v43  ;;  %v304_v51 = vadd.f32 %v279_v18, %v1223_v43  ;;  %v305_v52 = vadd.f32 %v283_v20, %v1223_v43  ;;  %v308_v53 = vmax.f32 %v300_v30, 0.0 }
  0xf5   :  { %v481_v54 = vadd.f32 %v480_v46, %v479_v39  ;;  %v488_v55 = vadd.f32 %v487_v47, %v486_v41  ;;  %v1273_v56 = vadd.f32 %v494_v48, %v493_v42  ;;  %v309_v57 = vmax.f32 %v301_v37, 0.0 }
  0xf6   :  { %v310_v58 = vmax.f32 %v302_v38, 0.0  ;;  %v311_v59 = vmax.f32 %v303_v50, 0.0  ;;  %v312_v60 = vmax.f32 %v304_v51, 0.0  ;;  %v317_v61 = vsel %vm316_vm1, %v308_v53, 0.0 }
  0xf7   :  { %v482_v62 = vrot.slane %v481_v54, 2  ;;  %v489_v63 = vrot.slane %v488_v55, 2  ;;  %v496_v0 = vrot.slane %v1273_v56, 2  ;;  %v318_v1 = vrot.slane %v317_v61, 4 }
  0xf8   :  { %v324_v2 = vsel %vm316_vm1, %v309_v57, 0.0  ;;  %v331_v3 = vsel %vm316_vm1, %v310_v58, 0.0  ;;  %v306_v4 = vadd.f32 %v287_v21, %v1223_v43  ;;  %v307_v6 = vadd.f32 %v291_v22, %v1223_v43 }
  0xf9   :  { %v1281_v7 = vadd.f32 %v482_v62, %v481_v54  ;;  %v1283_v8 = vadd.f32 %v489_v63, %v488_v55  ;;  %v319_v9 = vadd.f32 %v318_v1, %v317_v61  ;;  %v325_v10 = vrot.slane %v324_v2, 4 }
  0xfa   :  { %v332_v11 = vrot.slane %v331_v3, 4  ;;  %v313_v12 = vmax.f32 %v305_v52, 0.0  ;;  %v314_v14 = vmax.f32 %v306_v4, 0.0  ;;  %v315_v16 = vmax.f32 %v307_v6, 0.0 }
  0xfb   :  { %v320_v17 = vrot.slane %v319_v9, 2  ;;  %v326_v18 = vadd.f32 %v325_v10, %v324_v2  ;;  %v338_v19 = vsel %vm316_vm1, %v311_v59, 0.0  ;;  %v345_v20 = vsel %vm316_vm1, %v312_v60, 0.0 }
  0xfc   :  { %v333_v21 = vadd.f32 %v332_v11, %v331_v3  ;;  %v339_v43 = vrot.slane %v338_v19, 4  ;;  %v346_v22 = vrot.slane %v345_v20, 4  ;;  %v352_v23 = vsel %vm316_vm1, %v313_v12, 0.0 }
  0xfd   :  { %v327_v24 = vrot.slane %v326_v18, 2  ;;  %v321_v25 = vadd.f32 %v320_v17, %v319_v9  ;;  %v353_v26 = vrot.slane %v352_v23, 4  ;;  %v359_v30 = vsel %vm316_vm1, %v314_v14, 0.0 }
  0xfe   :  { %v334_v31 = vrot.slane %v333_v21, 2  ;;  %v340_v32 = vadd.f32 %v339_v43, %v338_v19  ;;  %v347_v33 = vadd.f32 %v346_v22, %v345_v20  ;;  %v360_v34 = vrot.slane %v359_v30, 4 }
  0xff   :  { %v322_v37 = vrot.slane %v321_v25, 1  ;;  %v328_v38 = vadd.f32 %v327_v24, %v326_v18  ;;  %v354_v39 = vadd.f32 %v353_v26, %v352_v23  ;;  %v366_v41 = vsel %vm316_vm1, %v315_v16, 0.0 }
 0x100   :  { %v335_v42 = vadd.f32 %v334_v31, %v333_v21  ;;  %v341_v46 = vrot.slane %v340_v32, 2  ;;  %v348_v47 = vrot.slane %v347_v33, 2  ;;  %v361_v48 = vadd.f32 %v360_v34, %v359_v30 }
 0x101   :  { %v323_v50 = vadd.f32 %v322_v37, %v321_v25  ;;  %v329_v51 = vrot.slane %v328_v38, 1  ;;  %v355_v52 = vrot.slane %v354_v39, 2  ;;  %v367_v53 = vrot.slane %v366_v41, 4 }
 0x102   :  { %v336_v54 = vrot.slane %v335_v42, 1  ;;  %v342_v55 = vadd.f32 %v341_v46, %v340_v32  ;;  %v349_v57 = vadd.f32 %v348_v47, %v347_v33  ;;  %v362_v58 = vrot.slane %v361_v48, 2 }
 0x103   :  { %v330_v59 = vadd.f32 %v329_v51, %v328_v38  ;;  %v356_v60 = vadd.f32 %v355_v52, %v354_v39  ;;  %v368_v61 = vadd.f32 %v367_v53, %v366_v41  ;;  %v470_v62 = vadd.f32 %v1221_v40, %v1236_v15 }
 0x104   :  { %v337_v63 = vadd.f32 %v336_v54, %v335_v42  ;;  %v343_v1 = vrot.slane %v342_v55, 1  ;;  %v350_v2 = vrot.slane %v349_v57, 1  ;;  %v363_v3 = vadd.f32 %v362_v58, %v361_v48 }
 0x105   :  { %v357_v4 = vrot.slane %v356_v60, 1  ;;  %v369_v6 = vrot.slane %v368_v61, 2  ;;  %v544_v9 = vsel %vm543_vm2, %v330_v59, %v323_v50  ;;  %v477_v10 = vmax.f32 %v1256_v29, 0.0 }
 0x106   :  { %v344_v11 = vadd.f32 %v343_v1, %v342_v55  ;;  %v351_v12 = vadd.f32 %v350_v2, %v349_v57  ;;  %v364_v14 = vrot.slane %v363_v3, 1  ;;  %v546_v16 = vsel %vm545_vm3, %v337_v63, %v544_v9 }
 0x107   :  { %v358_v17 = vadd.f32 %v357_v4, %v356_v60  ;;  %v370_v18 = vadd.f32 %v369_v6, %v368_v61  ;;  %v478_v19 = vmax.f32 %v470_v62, 0.0  ;;  %v484_v40 = vrot.slane %v1281_v7, 1 }
 0x108   :  { %v365_v15 = vadd.f32 %v364_v14, %v363_v3  ;;  %v548_v20 = vsel %vm547_vm4, %v344_v11, %v546_v16  ;;  %v491_v21 = vrot.slane %v1283_v8, 1  ;;  %v497_v43 = vadd.f32 %v496_v0, %v1273_v56  ;;  %v672_v14 = vld [vmem:[%s1393_s6 + $0x18] sm:$0xff] }
 0x109   :  { %v371_v29 = vrot.slane %v370_v18, 1  ;;  %v550_v22 = vsel %vm549_vm5, %v351_v12, %v548_v20  ;;  %v485_v23 = vadd.f32 %v484_v40, %v1281_v7  ;;  %v502_v24 = vadd.f32 %v501_v49, %v1267_v45  ;;  %v671_v12 = vld [vmem:[%s1393_s6 + $0x10] sm:$0xff]  ;;  %v580_v40 = vld [vmem:[%s1392_s5] sm:$0x1] }
 0x10a   :  { %v552_v25 = vsel %vm551_vm6, %v358_v17, %v550_v22  ;;  %v492_v26 = vadd.f32 %v491_v21, %v1283_v8  ;;  %v498_v30 = vrot.slane %v497_v43, 1  ;;  %v507_v31 = vsel %vm316_vm1, %v475_v35, 0.0  ;;  %v763_v17 = vld [vmem:[%s1395_s8] sm:$0xff] }
 0x10b   :  { %v372_v32 = vadd.f32 %v371_v29, %v370_v18  ;;  %v554_v56 = vsel %vm553_vm7, %v365_v15, %v552_v25  ;;  %v503_v0 = vrot.slane %v502_v24, 2  ;;  %v508_v33 = vrot.slane %v507_v31, 4  ;;  %v764_v18 = vld [vmem:[%s1395_s8 + $0x8] sm:$0xff] }
 0x10c   :  { %v499_v34 = vadd.f32 %v498_v30, %v497_v43  ;;  %v514_v7 = vsel %vm316_vm1, %v476_v36, 0.0  ;;  %v521_v45 = vsel %vm316_vm1, %v477_v10, 0.0  ;;  %v528_v49 = vsel %vm316_vm1, %v478_v19, 0.0 }
 0x10d   :  { %v556_v8 = vsel %vm555_vm8, %v372_v32, %v554_v56  ;;  %v504_v37 = vadd.f32 %v503_v0, %v502_v24  ;;  %v509_v27 = vadd.f32 %v508_v33, %v507_v31  ;;  %v515_v38 = vrot.slane %v514_v7, 4  ;;  %v766_v24 = vld [vmem:[%s1395_s8 + $0x18] sm:$0xff]  ;;  %v768_v31 = vld [vmem:[%s1395_s8 + $0x28] sm:$0xff]  ;;  %v888_v0 = vld [vmem:[%s1394_s7] ss:$0 sm:$0xff]  ;;  %s1063_s7 = scalar_lea.vmem %s871_s29, 256 }
 0x10e   :  { %970 = vmatprep.mubr.msk.f32.mxu0 %vm316_vm1, %v556_v8  ;;  %v522_v35 = vrot.slane %v521_v45, 4  ;;  %v529_v39 = vrot.slane %v528_v49, 4  ;;  %v565_v41 = vsel %vm543_vm2, %v492_v26, %v485_v23  ;;  %v1039_v16 = vpack.c.bf16 %v672_v14, %v671_v12  ;;  %v765_v23 = vld [vmem:[%s1395_s8 + $0x10] sm:$0xff]  ;;  %p1064_p0 = scmp.ne.s32.totalorder %s871_s29, %s1063_s7  ;;  %p1069_p2 = scmp.lt.s32.totalorder %s1063_s7, %s1063_s7 }
 0x10f   :  { %v505_v42 = vrot.slane %v504_v37, 1  ;;  %v510_v46 = vrot.slane %v509_v27, 2  ;;  %v516_v28 = vadd.f32 %v515_v38, %v514_v7  ;;  %v566_v36 = vsel %vm545_vm3, %v499_v34, %v565_v41 }
 0x110   :  { %v523_v47 = vadd.f32 %v522_v35, %v521_v45  ;;  %v530_v48 = vadd.f32 %v529_v39, %v528_v49  ;;  %1040 = vmatprep.subr.bf16.mxu1 %v1039_v16  ;;  %v1043_v19 = vpack.c.bf16 %v764_v18, %v763_v17  ;;  %v581_v15 = vmul.f32 8.0, %v580_v40  ;;  %p1070_p3 = por %p1069_p2, %p1068_p1 }
 0x111   :  { %v506_v50 = vadd.f32 %v505_v42, %v504_v37  ;;  %v511_v51 = vadd.f32 %v510_v46, %v509_v27  ;;  %v517_v52 = vrot.slane %v516_v28, 2  ;;  %1042 = vmatpush3.bf16.msra.mxu1 %v1039_v16  ;;  %v1047_v30 = vpack.c.bf16 %v766_v24, %v765_v23  ;;  %v893_v27 = vld [vmem:[%s1396_s9] ss:$0 sm:$0xff] }
 0x112   :  { %v524_v53 = vrot.slane %v523_v47, 2  ;;  %v531_v54 = vrot.slane %v530_v48, 2  ;;  %1044 = vmatprep.subr.bf16.mxu1 %v1043_v19  ;;  %v586_v20 = vrot.slane %v581_v15, %v1225_v44  ;;  %v767_v44 = vld [vmem:[%s1395_s8 + $0x20] sm:$0xff]  ;;  %p1071_p4 = pnand %p1070_p3, %p1064_p0 }
 0x113   :  { %v512_v55 = vrot.slane %v511_v51, 1  ;;  %v518_v57 = vadd.f32 %v517_v52, %v516_v28  ;;  %v567_v58 = vsel %vm547_vm4, %v506_v50, %v566_v36  ;;  %v1051_v32 = vpack.c.bf16 %v768_v31, %v767_v44 }
 0x114   :  { %v525_v59 = vadd.f32 %v524_v53, %v523_v47  ;;  %v532_v60 = vadd.f32 %v531_v54, %v530_v48 }
 0x115   :  { %v513_v61 = vadd.f32 %v512_v55, %v511_v51  ;;  %v519_v62 = vrot.slane %v518_v57, 1 }
 0x116   :  { %v526_v63 = vrot.slane %v525_v59, 1  ;;  %v533_v1 = vrot.slane %v532_v60, 1 }
 0x117   :  { %v520_v2 = vadd.f32 %v519_v62, %v518_v57  ;;  %v568_v3 = vsel %vm549_vm5, %v513_v61, %v567_v58 }
 0x118   :  { %v527_v4 = vadd.f32 %v526_v63, %v525_v59  ;;  %v534_v6 = vadd.f32 %v533_v1, %v532_v60 }
 0x119   :  { %v569_v9 = vsel %vm551_vm6, %v520_v2, %v568_v3 }
 0x11a   :  { %v570_v10 = vsel %vm553_vm7, %v527_v4, %v569_v9 }
 0x11b   :  { %v571_v11 = vsel %vm555_vm8, %v534_v6, %v570_v10 }
 0x11c   :  { %971 = vmatmul.mubr.msk.f32.vlgmr.msra.gmra.mrb[2].mxu0 %vm316_vm1, %v571_v11 }
 0x1ef   :  { %v972_v21 = vpop.f32.mrb[2].mxu0 }
 0x1f0   :  { %v664_v43 = vadd.f32 %v972_v21, %v586_v20  ;;  %v658_v29 = vpop.f32.mrb[3].mxu0 }
 0x1f1   :  { %v659_v22 = vadd.f32 %v658_v29, %v586_v20 }
 0x1f2   :  { %v668_v26 = vadd.f32 %v664_v43, %v1182_v13  ;;  %v770_v13 = vld [vmem:[%s1395_s8 + $0x38] sm:$0xff] }
 0x1f3   :  { %v667_v25 = vadd.f32 %v659_v22, %v1161_v5  ;;  %v769_v5 = vld [vmem:[%s1395_s8 + $0x30] sm:$0xff] }
 0x1f4   :  { %v1055_v56 = vpack.c.bf16 %v770_v13, %v769_v5 }
 0x1f5   :  { %981 = vmatprep.mubr.msk.f32.mxu1 %vm42_vm0, %v667_v25 }
 0x1f6   :  { %982 = vmatmul.mubr.msk.f32.vlgmr.msra.gmra.mrb[2].mxu1 %vm42_vm0, %v668_v26 }
 0x1f7   :  { %1046 = vmatpush3.bf16.msra.mxu1 %v1043_v19 }
 0x1f8   :  { %1048 = vmatprep.subr.bf16.mxu1 %v1047_v30 }
 0x1fb   :  { %1050 = vmatpush3.bf16.msra.mxu1 %v1047_v30 }
 0x1fc   :  { %1052 = vmatprep.subr.bf16.mxu1 %v1051_v32 }
 0x1ff   :  { %1054 = vmatpush3.bf16.msra.mxu1 %v1051_v32 }
 0x200   :  { %1056 = vmatprep.subr.bf16.mxu1 %v1055_v56 }
 0x203   :  { %1058 = vmatpush3.bf16.msra.mxu1 %v1055_v56 }
 0x2c9   :  { %v983_v33 = vpop.f32.mrb[2].mxu1 }
 0x2ca   :  { %v758_v34 = vadd.f32 %v983_v33, %v888_v0  ;;  %v752_v7 = vpop.f32.mrb[3].mxu1 }
 0x2cb   :  { %v753_v45 = vadd.f32 %v888_v0, %v752_v7 }
 0x2cc   :  { %v762_v8 = vmax.f32 %v758_v34, 0.0 }
 0x2cd   :  { %v761_v49 = vmax.f32 %v753_v45, 0.0 }
 0x2cf   :  { %1000 = vmatprep.mubr.msk.f32.mxu1 %vm316_vm1, %v761_v49 }
 0x2d0   :  { %1001 = vmatmul.mubr.msk.f32.vlgmr.msra.gmra.mrb[4].mxu1 %vm316_vm1, %v762_v8 }
 0x3a3   :  { %v1002_v37 = vpop.f32.mrb[4].mxu1 }
 0x3a4   :  { %v853_v38 = vadd.f32 %v1002_v37, %v668_v26  ;;  %v843_v35 = vpop.f32.mrb[5].mxu1 }
 0x3a5   :  { %v852_v39 = vadd.f32 %v843_v35, %v667_v25 }
 0x3a6   :  { %v862_v41 = vadd.f32 %v893_v27, %v853_v38 }
 0x3a7   :  { %v861_v42 = vadd.f32 %v893_v27, %v852_v39 }
 0x3a8   :  { %864 = vst.msk [vmem:[#allocation2 + $0x8] sm:$0xff] %vm42_vm0, %v862_v41 }
 0x3a9   :  { %863 = vst.msk [vmem:[#allocation2] sm:$0xff] %vm42_vm0, %v861_v42 }
 0x3aa   :  { %1074 = shalt.err (!%p1071_p4)
}
 0x3ab   :  { %s1075_s30 = scalar_lea.hbm %s1397_s10, 256 }
 0x3ac   :  { %p1076_p5 = scmp.ne.s32.totalorder %s1397_s10, %s1075_s30  ;;  %p1079_p6 = scmp.lt.u32.totalorder %s1075_s30, %s1397_s10 }
 0x3ae   :  { %p1081_p7 = pnand %p1079_p6, %p1076_p5 }
 0x3b0   :  { %1084 = shalt.err (!%p1081_p7)
}
 0x3b1   :  { %s1089_s14 = smov 128   ;;  %s1090_s15 = smov 8  }
 0x3b2   :  { %876 = dma.vmem_to_hbm [thread:$0]  %s871_s29, 256, %s1397_s10, [#allocation3], %s1089_s14, %s1089_s14, %s1090_s15  }
 0x3b3   :  { %1085 = dma.done.wait [#allocation3], 256  }
 0x3b4   :  { %1086 = vsyncadd [#allocation3], 4294967040 }
 0x3b5   :  { %880 = vsyncpa [#allocation3], 1 }

</bundles_post_ra>
